<compile_context>
chip_gen: v7x
topology: tpu7x:2x2x1
jax: 0.10.0
libtpu: 0.0.40
codegen_flags: <defaults>
</compile_context>

<pallas_src>
import math
from functools import partial

import jax
import jax.numpy as jnp
from jax.experimental import pallas as pl
from jax.experimental.pallas import tpu as pltpu


def _fourier_kernel(x_ref, wt_ref, o_ref):
    # x_ref:  [TB, Cin]     (VMEM)
    # wt_ref: [Cin, half]   (VMEM)  -- (2*pi * weight).T, resident across grid
    # o_ref:  [TB, 2*half]  (VMEM)
    half = wt_ref.shape[1]
    f = jnp.dot(x_ref[...], wt_ref[...], preferred_element_type=jnp.float32)
    # Two direct sliced stores instead of concatenate: no [TB, 2*half]
    # temporary, and cos/sin halves are never live simultaneously.
    o_ref[:, :half] = jnp.cos(f).astype(o_ref.dtype)
    o_ref[:, half:] = jnp.sin(f).astype(o_ref.dtype)


def _choose_batch_tile(batch, in_features, out_features,
                       budget_bytes=16 * 1024 * 1024, max_tb=2048):
    """Pick a batch tile so 2 double-buffered (x + out) f32 tiles fit the budget."""
    per_row = 2 * (in_features + out_features) * 4  # double-buffered, f32
    tb = max(8, min(budget_bytes // per_row, max_tb))
    tb = (tb // 8) * 8  # sublane multiple
    if batch <= tb:
        return batch  # full-dim block is always layout-legal
    return tb


@partial(jax.jit, static_argnames=("tb", "out_dtype"))
def fourier_features(x, weight, *, tb=None, out_dtype=jnp.float32):
    """x: [batch, in_features]; weight: [out_features//2, in_features]."""
    batch, in_features = x.shape
    half, in_features_w = weight.shape
    assert in_features == in_features_w
    out_features = 2 * half

    if tb is None:
        tb = _choose_batch_tile(batch, in_features, out_features)

    # Glue in plain JAX: transpose once and fold the 2*pi scale into the
    # (tiny) weight so the kernel is just matmul + cos/sin + store.
    w_t = (2.0 * math.pi) * weight.T.astype(jnp.float32)  # [in_features, half]

    # Pad batch up to a multiple of the tile (padded rows sliced off below).
    padded_batch = pl.cdiv(batch, tb) * tb
    x_in = x
    if padded_batch != batch:
        x_in = jnp.pad(x, ((0, padded_batch - batch), (0, 0)))

    grid = (padded_batch // tb,)

    cost = pl.CostEstimate(
        flops=2 * batch * in_features * half,
        transcendentals=batch * out_features,
        bytes_accessed=4 * (batch * in_features + in_features * half)
        + jnp.dtype(out_dtype).itemsize * batch * out_features,
    )

    out = pl.pallas_call(
        _fourier_kernel,
        out_shape=jax.ShapeDtypeStruct((padded_batch, out_features), out_dtype),
        grid_spec=pltpu.PrefetchScalarGridSpec(
            num_scalar_prefetch=0,
            grid=grid,
            in_specs=[
                pl.BlockSpec((tb, in_features), lambda i: (i, 0)),
                pl.BlockSpec((in_features, half), lambda i: (0, 0)),  # resident
            ],
            out_specs=pl.BlockSpec((tb, out_features), lambda i: (i, 0)),
        ),
        compiler_params=pltpu.CompilerParams(
            dimension_semantics=("parallel",),   # shards batch across TCs on v7x
            vmem_limit_bytes=32 * 1024 * 1024,   # explicit; tiles sized to fit
        ),
        cost_estimate=cost,
    )(x_in, w_t)

    if padded_batch != batch:
        out = out[:batch]
    return out


if __name__ == "__main__":
    key = jax.random.PRNGKey(0)
    k_x, k_w, k_x2 = jax.random.split(key, 3)

    batch = 8
    in_features = 4
    out_features = 32  # must be even
    std = 1.0

    # Deterministic "buffer" init, mirroring torch.randn([out//2, in]) * std.
    weight = jax.random.normal(k_w, (out_features // 2, in_features), jnp.float32) * std
    x = jax.random.normal(k_x, (batch, in_features), jnp.float32)

    out = fourier_features(x, weight)
    out = jax.block_until_ready(out)

    # Reference check in plain JAX (same math as the PyTorch module).
    f_ref = 2.0 * math.pi * (x @ weight.T)
    ref = jnp.concatenate([jnp.cos(f_ref), jnp.sin(f_ref)], axis=-1)
    assert out.shape == (batch, out_features)
    assert jnp.allclose(out, ref, atol=1e-5, rtol=1e-5)

    # Exercise the multi-tile + padding path (batch not a multiple of the tile).
    batch2 = 50
    x2 = jax.random.normal(k_x2, (batch2, in_features), jnp.float32)
    out2 = jax.block_until_ready(fourier_features(x2, weight, tb=16))
    f2 = 2.0 * math.pi * (x2 @ weight.T)
    ref2 = jnp.concatenate([jnp.cos(f2), jnp.sin(f2)], axis=-1)
    assert out2.shape == (batch2, out_features)
    assert jnp.allclose(out2, ref2, atol=1e-5, rtol=1e-5)

    print("KERNEL_OK")
</pallas_src>

<mosaic_0001>
module attributes {stable_mosaic.version = 11 : i64} {
  func.func @_fourier_kernel(%arg0: i32, %arg1: memref<8x4xf32, #tpu.memory_space<vmem>>, %arg2: memref<4x16xf32, #tpu.memory_space<vmem>>, %arg3: memref<8x32xf32, #tpu.memory_space<vmem>>) attributes {dimension_semantics = [#tpu.dimension_semantics<parallel>], iteration_bounds = array<i64: 1>, scalar_prefetch = 0 : i64, scratch_operands = 0 : i64, tpu.core_type = #tpu.core_type<tc>, window_params = [{transform_indices = @transform_0, window_bounds = array<i64: 8, 4>}, {pipeline_mode = #tpu.pipeline_mode<synchronous>, transform_indices = @transform_1, window_bounds = array<i64: 4, 16>}, {transform_indices = @transform_2, window_bounds = array<i64: 8, 32>}]} {
    %c0 = arith.constant 0 : index
    %c0_0 = arith.constant 0 : index
    %0 = vector.load %arg1[%c0, %c0_0] : memref<8x4xf32, #tpu.memory_space<vmem>>, vector<8x4xf32>
    %c0_1 = arith.constant 0 : index
    %c0_2 = arith.constant 0 : index
    %1 = vector.load %arg2[%c0_1, %c0_2] : memref<4x16xf32, #tpu.memory_space<vmem>>, vector<4x16xf32>
    %cst = arith.constant dense<0.000000e+00> : vector<8x16xf32>
    %2 = tpu.matmul %0, %1, %cst {dimension_numbers = #tpu.dot_dimension_numbers<[1], [0], [0], [1], [0, 0, 1, 1], [], []>} : vector<8x4xf32>, vector<4x16xf32>, vector<8x16xf32> -> vector<8x16xf32>
    %3 = math.cos %2 : vector<8x16xf32>
    %c0_3 = arith.constant 0 : index
    %c0_4 = arith.constant 0 : index
    %4 = vector.load %arg3[%c0_3, %c0_4] : memref<8x32xf32, #tpu.memory_space<vmem>>, vector<8x16xf32>
    tpu.vector_store %arg3[%c0_3, %c0_4], %3 {strides = array<i32>} : memref<8x32xf32, #tpu.memory_space<vmem>>, vector<8x16xf32>,
    %5 = math.sin %2 : vector<8x16xf32>
    %c0_5 = arith.constant 0 : index
    %c16 = arith.constant 16 : index
    %6 = vector.load %arg3[%c0_5, %c16] : memref<8x32xf32, #tpu.memory_space<vmem>>, vector<8x16xf32>
    tpu.vector_store %arg3[%c0_5, %c16], %5 {strides = array<i32>} : memref<8x32xf32, #tpu.memory_space<vmem>>, vector<8x16xf32>,
    return
  }
  func.func @transform_0(%arg0: i32) -> (i32, i32) {
    %c0_i32 = arith.constant 0 : i32
    %c0_i32_0 = arith.constant 0 : i32
    return %arg0, %c0_i32 : i32, i32
  }
  func.func @transform_1(%arg0: i32) -> (i32, i32) {
    %c0_i32 = arith.constant 0 : i32
    %c0_i32_0 = arith.constant 0 : i32
    %c0_i32_1 = arith.constant 0 : i32
    return %c0_i32, %c0_i32_0 : i32, i32
  }
  func.func @transform_2(%arg0: i32) -> (i32, i32) {
    %c0_i32 = arith.constant 0 : i32
    %c0_i32_0 = arith.constant 0 : i32
    return %arg0, %c0_i32 : i32, i32
  }
}

</mosaic_0001>

<bundles_post_ra>
// kernel: fourier_features.1
= control target key start
LH: loop header
LB: loop body
LE: loop exit
PB: predicated region body
PF: predicated region fallthrough
CT: control target
= control target key end

     0   :  { %vm18_vm0 = vcmask 1043456   ;;  %v380_v2 = vmov 0.0   ;;  %vm381_vm1 = vmmov 0   ;;  %vm14_vm2 = vcmask 31744   ;;  %s444_s0 = inlined_call_operand.vmem [shape: f32[8,4], index: 0, kind: input, shape index: {}]   ;;  %s445_s1 = inlined_call_operand.vmem [shape: f32[4,16], index: 1, kind: input, shape index: {}]   ;;  %s446_s2 = inlined_call_operand.hbm [shape: f32[8,32], index: 2, kind: output, shape index: {}]  }
   0x1   :  { %v13_v0 = vld [vmem:[%s445_s1] sm:$0xf]  ;;  %333 = vmatprep.subr.mxu0 %v380_v2  ;;  %335 = vmatprep.mubr.msk.f32.mxu0 %vm381_vm1, %v380_v2 }
   0x2   :  { %v12_v1 = vld [vmem:[%s444_s0] sm:$0xff] }
   0x3   :  { %7 = vsyncpa [#allocation3], 0  ;;  %334 = vmatpush3.msk.msra.mxu0 %vm18_vm0, %v13_v0  ;;  %v382_v15 = vmov 683565275   ;;  %v383_v17 = vmov 2475754826  }
   0x4   :  { %336 = vmatmul.mubr.msk.f32.vlgmr.msra.gmra.mrb[0].mxu0 %vm14_vm2, %v12_v1  ;;  %v384_v20 = vmov 2131351028   ;;  %v385_v23 = vmov 2102212464   ;;  %v386_v26 = vmov 920167782  }
   0x5   :  { %v387_v29 = vmov 1326507024   ;;  %vm195_vm13 = vcmask 130048   ;;  %s388_s0 = smov 16   ;;  %s389_s1 = smov [#allocation2]  }
   0x6   :  { %s313_s13 = sshll.u32 %s389_s1, 4  ;;  %s314_s13 = int_to_ptr.vmem [resolvable:$true] %s313_s13 }
   0x7   :  { %s356_s14 = scalar_lea.vmem %s314_s13, 128  ;;  %p361_p1 = scmp.lt.s32.totalorder %s314_s13, %s314_s13 }
   0x8   :  { %p357_p0 = scmp.ne.s32.totalorder %s314_s13, %s356_s14  ;;  %p362_p2 = scmp.lt.s32.totalorder %s356_s14, %s356_s14 }
   0xa   :  { %p363_p3 = por %p362_p2, %p361_p1 }
   0xc   :  { %p364_p4 = pnand %p363_p3, %p357_p0 }
  0xd7   :  { %v411_v3 = vpop.f32.mrb[0].mxu0 }
  0xd8   :  { %v95_v4 = vand.u32 2139095040, %v411_v3  ;;  %v337_v5 = vpop.f32.mrb[1].mxu0  ;;  %v92_v9 = vand.u32 2147483647, %v411_v3  ;;  %vm94_vm10 = vcmp.lt.s32.totalorder %v411_v3, 0 }
  0xda   :  { %v96_v6 = vshrl.u32 %v95_v4, 23  ;;  %v99_v12 = vand.u32 8388607, %v92_v9  ;;  %vm93_vm11 = vcmp.le.f32.partialorder %v92_v9, 0.7853982 }
  0xdc   :  { %v323_v7 = vadd.s32 4294967169, %v96_v6  ;;  %v100_v31 = vor.u32 8388608, %v99_v12 }
  0xde   :  { %v102_v8 = vadd.s32 1, %v323_v7  ;;  %v140_v45 = vshll.u32 %v100_v31, 8 }
  0xe0   :  { %vm103_vm3 = vcmp.gt.s32.totalorder %v102_v8, 0 }
  0xe1   :  { %v104_v10 = vsel %vm103_vm3, %v102_v8, 0  ;;  %vm184_vm3 = vweird.f32 %v411_v3 }
  0xe2   :  { %v106_v11 = vand.u32 31, %v104_v10  ;;  %v105_v14 = vshrl.u32 %v104_v10, 5 }
  0xe4   :  { %v107_v13 = vsub.s32 32, %v106_v11  ;;  %v109_v16 = vshll.u32 %v382_v15, %v106_v11  ;;  %v112_v18 = vshll.u32 %v383_v17, %v106_v11  ;;  %v115_v22 = vshll.u32 %v384_v20, %v106_v11 }
  0xe5   :  { %v118_v25 = vshll.u32 %v385_v23, %v106_v11  ;;  %v121_v28 = vshll.u32 %v386_v26, %v106_v11  ;;  %vm124_vm4 = vcmp.lt.s32.totalorder %v105_v14, 1  ;;  %vm127_vm5 = vcmp.lt.s32.totalorder %v105_v14, 4 }
  0xe6   :  { %v110_v19 = vshrl.u32 %v383_v17, %v107_v13  ;;  %v113_v21 = vshrl.u32 %v384_v20, %v107_v13  ;;  %v116_v24 = vshrl.u32 %v385_v23, %v107_v13  ;;  %v119_v27 = vshrl.u32 %v386_v26, %v107_v13 }
  0xe7   :  { %v122_v30 = vshrl.u32 %v387_v29, %v107_v13  ;;  %v108_v40 = vshrl.u32 %v382_v15, %v107_v13  ;;  %vm126_vm6 = vcmp.lt.s32.totalorder %v105_v14, 3  ;;  %vm125_vm7 = vcmp.lt.s32.totalorder %v105_v14, 2 }
  0xe8   :  { %v111_v32 = vor.u32 %v110_v19, %v109_v16  ;;  %v114_v33 = vor.u32 %v113_v21, %v112_v18  ;;  %v117_v34 = vor.u32 %v116_v24, %v115_v22  ;;  %v120_v35 = vor.u32 %v119_v27, %v118_v25 }
  0xe9   :  { %v123_v36 = vor.u32 %v122_v30, %v121_v28 }
  0xea   :  { %v129_v37 = vsel %vm127_vm5, %v117_v34, 2102212464  ;;  %v132_v38 = vsel %vm124_vm4, %v111_v32, %v114_v33  ;;  %v136_v39 = vsel %vm124_vm4, %v114_v33, %v117_v34  ;;  %v133_v41 = vsel %vm127_vm5, %v120_v35, 920167782 }
  0xeb   :  { %v137_v42 = vsel %vm127_vm5, %v123_v36, 1326507024  ;;  %v134_v43 = vsel %vm126_vm6, %v117_v34, %v133_v41  ;;  %v128_v46 = vsel %vm124_vm4, %v108_v40, %v111_v32  ;;  %v130_v47 = vsel %vm126_vm6, %v114_v33, %v129_v37 }
  0xec   :  { %v138_v44 = vsel %vm126_vm6, %v120_v35, %v137_v42  ;;  %v135_v48 = vsel %vm125_vm7, %v132_v38, %v134_v43  ;;  %v131_v54 = vsel %vm125_vm7, %v128_v46, %v130_v47  ;;  %vm305_vm4 = vcmask 261248  }
  0xed   :  { %v139_v49 = vsel %vm125_vm7, %v136_v39, %v138_v44  ;;  %v420_v52 = vmul.u32.u64.low %v140_v45, %v135_v48  ;;  %v421_v53 = vmul.u32.u64.high %v140_v45, %v135_v48, %v420_v52  ;;  %v147_v56 = vmul.u32 %v140_v45, %v131_v54 }
  0xee   :  { %v417_v50 = vmul.u32.u64.low %v140_v45, %v139_v49  ;;  %v418_v51 = vmul.u32.u64.high %v140_v45, %v139_v49, %v417_v50 }
  0xef   :  { %v150_v55 = vadd.s32 1, %v421_v53 }
  0xf0   :  { %vm149_vm8 = vc.u32 %v418_v51, %v420_v52  ;;  %v148_v5 = vadd.s32 %v420_v52, %v418_v51 }
  0xf1   :  { %v151_v57 = vsel %vm149_vm8, %v150_v55, %v421_v53 }
  0xf2   :  { %v152_v58 = vadd.s32 %v151_v57, %v147_v56 }
  0xf4   :  { %v153_v59 = vadd.s32 536870912, %v152_v58 }
  0xf6   :  { %v154_v60 = vshrl.u32 %v153_v59, 30 }
  0xf8   :  { %v155_v61 = vshll.u32 %v154_v60, 30  ;;  %v178_v18 = vsub.s32 4, %v154_v60 }
  0xfa   :  { %v156_v62 = vsub.s32 %v152_v58, %v155_v61  ;;  %v179_v21 = vsel %vm94_vm10, %v178_v18, %v154_v60 }
  0xfb   :  { %v181_v23 = vsel %vm93_vm11, 0, %v179_v21 }
  0xfc   :  { %v158_v63 = vsub.s32 0, %v156_v62  ;;  %v290_v24 = vadd.s32 3, %v181_v23  ;;  %v185_v25 = vand.u32 3, %v181_v23 }
  0xfe   :  { %v324_v0 = vmin.u32 %v158_v63, %v156_v62  ;;  %v291_v26 = vand.u32 3, %v290_v24  ;;  %vm190_vm12 = vcmp.eq.s32.totalorder %v185_v25, 2  ;;  %vm187_vm15 = vcmp.eq.s32.totalorder %v185_v25, 0 }
  0xff   :  { %vm186_vm1 = vcmp.lt.s32.totalorder %v185_v25, 2 }
 0x100   :  { %v160_v1 = vclz %v324_v0  ;;  %vm296_vm14 = vcmp.eq.s32.totalorder %v291_v26, 2  ;;  %vm293_vm0 = vcmp.eq.s32.totalorder %v291_v26, 0  ;;  %vm292_vm2 = vcmp.lt.s32.totalorder %v291_v26, 2 }
 0x102   :  { %v325_v2 = vadd.s32 4294967294, %v160_v1 }
 0x104   :  { %vm326_vm9 = vcmp.lt.s32.totalorder %v325_v2, 0 }
 0x105   :  { %v163_v4 = vsel %vm326_vm9, 0, %v325_v2 }
 0x106   :  { %v164_v6 = vsub.s32 32, %v163_v4  ;;  %v168_v7 = vsub.s32 4294967266, %v163_v4  ;;  %v165_v8 = vshll.u32 %v156_v62, %v163_v4 }
 0x108   :  { %v166_v10 = vshrl.u32 %v148_v5, %v164_v6  ;;  %v169_v11 = vadd.s32 127, %v168_v7 }
 0x10a   :  { %v167_v12 = vor.u32 %v166_v10, %v165_v8  ;;  %v170_v13 = vshll.u32 %v169_v11, 23 }
 0x10c   :  { %v171_v14 = vor.u32 4788187, %v170_v13  ;;  %v174_v16 = vcvt.s32.f32 %v167_v12 }
 0x10e   :  { %v172_v15 = vand.u32 2147483647, %v171_v14 }
 0x110   :  { %v175_v17 = vmul.f32 %v174_v16, %v172_v15 }
 0x112   :  { %v176_v19 = vxor.u32 2147483648, %v175_v17 }
 0x114   :  { %v177_v20 = vsel %vm94_vm10, %v176_v19, %v175_v17 }
 0x115   :  { %v180_v22 = vsel %vm93_vm11, %v411_v3, %v177_v20 }
 0x116   :  { %352 = vcosq.f32 %v180_v22 }
 0x117   :  { %354 = vsinq.f32 %v180_v22 }
 0x120   :  { %v353_v27 = vpop.eup %352 }
 0x121   :  { %v355_v28 = vpop.eup %354  ;;  %v191_v29 = vxor.u32 2147483648, %v353_v27 }
 0x122   :  { %v188_v30 = vxor.u32 2147483648, %v355_v28 }
 0x123   :  { %v192_v31 = vsel %vm190_vm12, %v191_v29, %v355_v28  ;;  %v298_v9 = vsel %vm296_vm14, %v191_v29, %v355_v28 }
 0x124   :  { %v189_v32 = vsel %vm187_vm15, %v353_v27, %v188_v30  ;;  %v295_v33 = vsel %vm293_vm0, %v353_v27, %v188_v30 }
 0x125   :  { %v193_v34 = vsel %vm186_vm1, %v189_v32, %v192_v31  ;;  %v299_v35 = vsel %vm292_vm2, %v295_v33, %v298_v9 }
 0x126   :  { %v194_v36 = vsel %vm184_vm3, nan, %v193_v34  ;;  %v300_v37 = vsel %vm184_vm3, nan, %v299_v35 }
 0x127   :  { %196 = vst.msk [vmem:[#allocation2] sm:$0xff] %vm195_vm13, %v194_v36  ;;  %302 = vrot.lane.b32.xlu0 %v300_v37, %s388_s0 }
 0x199   :  { %v303_v38 = vpop.permute.xlu0 %302 }
 0x19a   :  { %306 = vst.msk [vmem:[#allocation2] sm:$0xff] %vm305_vm4, %v303_v38 }
 0x19b   :  { %367 = shalt.err (!%p364_p4)
}
 0x19c   :  { %s368_s17 = scalar_lea.hbm %s446_s2, 128 }
 0x19d   :  { %p369_p5 = scmp.ne.s32.totalorder %s446_s2, %s368_s17  ;;  %p372_p6 = scmp.lt.u32.totalorder %s368_s17, %s446_s2 }
 0x19f   :  { %p374_p7 = pnand %p372_p6, %p369_p5 }
 0x1a1   :  { %377 = shalt.err (!%p374_p7)
}
 0x1a2   :  { %316 = dma.vmem_to_hbm [thread:$0]  %s314_s13, 128, %s446_s2, [#allocation3]  }
 0x1a3   :  { %378 = dma.done.wait [#allocation3], 128  }
 0x1a4   :  { %379 = vsyncadd [#allocation3], 4294967168 }
 0x1a5   :  { %320 = vsyncpa [#allocation3], 1 }

</bundles_post_ra>
